<compile_context>
chip_gen: v5e
topology: v5e:2x2
jax: 0.10.0
libtpu: 0.0.40
codegen_flags: <defaults>
</compile_context>

<pallas_src>
import functools

import jax
import jax.numpy as jnp
from jax import lax
from jax.experimental import pallas as pl
from jax.experimental.pallas import tpu as pltpu


def _round_up(x, m):
    return ((x + m - 1) // m) * m


# ---------------------------------------------------------------------------
# Fast path: whole spatial extent (HW) in one block; 1-D grid over row tiles.
# ---------------------------------------------------------------------------
def tbb_kernel(x_ref, o_ref, *, inv_hw):
    # x_ref / o_ref: (tile_r, HW).  Rows are independent (batch*channel).
    x = x_ref[...]
    xf = x.astype(jnp.float32)
    # Spatial mean per row: lane-axis sum times a static reciprocal of the TRUE
    # spatial size (no padding anywhere, so the sum is exact).
    mean = jnp.sum(xf, axis=-1, keepdims=True) * inv_hw
    o_ref[...] = (xf + mean).astype(o_ref.dtype)


# ---------------------------------------------------------------------------
# Chunked path for very large HW: two phases over HW chunks per row block.
#   phase 0: accumulate per-row f32 sums (lane-masked for the ragged last chunk)
#   phase 1: re-stream chunks and write x + mean
# ---------------------------------------------------------------------------
def tbb_chunked_kernel(x_ref, o_ref, acc_ref, *, inv_hw, chunk_hw, hw_total):
    p = pl.program_id(1)   # phase
    h = pl.program_id(2)   # hw chunk

    @pl.when(jnp.logical_and(p == 0, h == 0))
    def _():
        acc_ref[...] = jnp.zeros_like(acc_ref)

    x = x_ref[...]

    @pl.when(p == 0)
    def _():
        xf = x.astype(jnp.float32)
        # Lanes past the true spatial extent (ragged last chunk) hold unspecified
        # data; mask them out of the sum.
        lane = lax.broadcasted_iota(jnp.int32, x.shape, 1)
        valid = (h * chunk_hw + lane) < hw_total
        acc_ref[...] += jnp.sum(jnp.where(valid, xf, 0.0), axis=-1, keepdims=True)

    @pl.when(p == 1)
    def _():
        mean = acc_ref[...] * inv_hw
        o_ref[...] = (x.astype(jnp.float32) + mean).astype(o_ref.dtype)


def tbb_forward(x, *, target_block_bytes=4 << 20, hw_chunk=None):
    """x: (B, C, H, W) -> (B, C, H, W); out[b,c,:,:] = x[b,c,:,:] + mean(x[b,c,:,:])."""
    B, C, H, W = x.shape
    HW = H * W
    R = B * C
    dtype = x.dtype
    itemsize = jnp.dtype(dtype).itemsize

    # Sublane packing granularity: 8 rows (32-bit), 16 (16-bit), 32 (8-bit).
    if itemsize >= 4:
        row_align = 8
    elif itemsize == 2:
        row_align = 16
    else:
        row_align = 32

    x_flat = x.reshape(R, HW)          # contiguous reshape: no data movement
    inv_hw = float(1.0 / HW)

    # Decide path: a minimal full-HW slab (row_align rows), double-buffered for
    # both input and output, must fit comfortably inside every generation's
    # scoped VMEM budget (v7x scoped default = 32 MiB); otherwise chunk HW.
    min_rows = min(row_align, R)
    slab_bytes = min_rows * HW * itemsize
    if hw_chunk is None and 4 * slab_bytes > (24 << 20):
        hw_chunk = max(128, ((target_block_bytes // (min_rows * itemsize)) // 128) * 128)

    if hw_chunk is None:
        # ------------------------------ fast path ------------------------------
        rows_per_block = max(1, target_block_bytes // (HW * itemsize))
        tile_r = max(row_align, (rows_per_block // row_align) * row_align)
        if tile_r >= R:
            tile_r = R   # block dim == full array dim: always a legal block shape
        else:
            # Prefer >= 4 grid steps (megacore + double buffering) while keeping
            # blocks >= ~512 KiB.
            min_block_bytes = 512 << 10
            while (pl.cdiv(R, tile_r) < 4 and tile_r > row_align
                   and (tile_r // 2) * HW * itemsize >= min_block_bytes):
                new_tile = max(row_align, ((tile_r // 2) // row_align) * row_align)
                if new_tile >= tile_r:
                    break
                tile_r = new_tile

        tile_bytes = tile_r * HW * itemsize
        # in + out, double-buffered (4x tile) + headroom.
        vmem_limit = min(max(6 * tile_bytes, 16 << 20), 48 << 20)

        kernel = functools.partial(tbb_kernel, inv_hw=inv_hw)
        out_flat = pl.pallas_call(
            kernel,
            out_shape=jax.ShapeDtypeStruct((R, HW), dtype),
            grid_spec=pltpu.PrefetchScalarGridSpec(
                num_scalar_prefetch=0,
                grid=(pl.cdiv(R, tile_r),),
                in_specs=[pl.BlockSpec((tile_r, HW), lambda r: (r, 0))],
                out_specs=pl.BlockSpec((tile_r, HW), lambda r: (r, 0)),
            ),
            compiler_params=pltpu.CompilerParams(
                dimension_semantics=("parallel",),
                vmem_limit_bytes=int(vmem_limit),
            ),
            cost_estimate=pl.CostEstimate(
                flops=2 * R * HW,
                transcendentals=0,
                bytes_accessed=2 * R * HW * itemsize,
            ),
            # input_output_aliases={0: 0} would be valid here (each block is fully
            # read before written) but is left off so XLA never has to copy a
            # non-donated caller buffer.
        )(x_flat)
        return out_flat.reshape(B, C, H, W)

    # ------------------------------ chunked path ------------------------------
    chunk_hw = min(_round_up(int(hw_chunk), 128), _round_up(HW, 128))
    tile_r = min(row_align, R)
    num_hw = pl.cdiv(HW, chunk_hw)
    tile_bytes = tile_r * chunk_hw * itemsize
    vmem_limit = min(max(6 * tile_bytes, 16 << 20), 48 << 20)

    kernel = functools.partial(
        tbb_chunked_kernel, inv_hw=inv_hw, chunk_hw=chunk_hw, hw_total=HW)
    out_flat = pl.pallas_call(
        kernel,
        out_shape=jax.ShapeDtypeStruct((R, HW), dtype),
        grid_spec=pltpu.PrefetchScalarGridSpec(
            num_scalar_prefetch=0,
            grid=(pl.cdiv(R, tile_r), 2, num_hw),
            in_specs=[pl.BlockSpec((tile_r, chunk_hw), lambda r, p, h: (r, h))],
            out_specs=pl.BlockSpec((tile_r, chunk_hw), lambda r, p, h: (r, h)),
            scratch_shapes=[pltpu.VMEM((tile_r, 1), jnp.float32)],
        ),
        compiler_params=pltpu.CompilerParams(
            dimension_semantics=("parallel", "arbitrary", "arbitrary"),
            vmem_limit_bytes=int(vmem_limit),
        ),
        cost_estimate=pl.CostEstimate(
            flops=3 * R * HW,
            transcendentals=0,
            bytes_accessed=4 * R * HW * itemsize,
        ),
    )(x_flat)
    return out_flat.reshape(B, C, H, W)


def tbb_reference(x):
    # Pure-JAX reference mirroring the PyTorch forward exactly.
    B, C, H, W = x.shape
    token = jnp.transpose(x, (0, 2, 3, 1)).reshape(B, -1, C)      # (B, HW, C)
    mean = jnp.mean(token, axis=1, keepdims=True)                 # (B, 1, C)
    y = token + mean
    return jnp.transpose(y, (0, 2, 1)).reshape(B, C, H, W)


if __name__ == "__main__":
    key = jax.random.PRNGKey(0)
    k0, k1, k2, k3 = jax.random.split(key, 4)

    # 1) Primary small-shape test (module's expected usage) -- fast path, grid=1.
    x = jax.random.normal(k0, (2, 4, 16, 16), dtype=jnp.float32)
    out = jax.block_until_ready(tbb_forward(x))
    ref = tbb_reference(x)
    assert out.shape == x.shape
    assert jnp.allclose(out, ref, atol=1e-5, rtol=1e-5), "mismatch (primary)"

    # 2) Non-aligned dims, no padding anywhere: R=6 rows, HW=49 lanes (full-dim blocks).
    x2 = jax.random.normal(k1, (2, 3, 7, 7), dtype=jnp.float32)
    out2 = jax.block_until_ready(tbb_forward(x2))
    assert jnp.allclose(out2, tbb_reference(x2), atol=1e-5, rtol=1e-5), "mismatch (7x7)"

    # 3) Ragged last row block (R=20, tile_r=8, grid=3): OOB rows must be masked off.
    x3 = jax.random.normal(k2, (4, 5, 8, 8), dtype=jnp.float32)
    out3 = jax.block_until_ready(tbb_forward(x3, target_block_bytes=2048))
    assert jnp.allclose(out3, tbb_reference(x3), atol=1e-5, rtol=1e-5), "mismatch (ragged R)"

    # 4) Force the HW-chunked two-phase path (HW=192, chunk=128 -> ragged last chunk).
    x4 = jax.random.normal(k3, (2, 4, 16, 12), dtype=jnp.float32)
    out4 = jax.block_until_ready(tbb_forward(x4, hw_chunk=128))
    assert jnp.allclose(out4, tbb_reference(x4), atol=1e-5, rtol=1e-5), "mismatch (chunked)"

    print("KERNEL_OK")
</pallas_src>

<mosaic_0001>
module attributes {stable_mosaic.version = 11 : i64} {
  func.func @tbb_kernel(%arg0: i32, %arg1: memref<8x256xf32, #tpu.memory_space<vmem>>, %arg2: memref<8x256xf32, #tpu.memory_space<vmem>>) attributes {dimension_semantics = [#tpu.dimension_semantics<parallel>], iteration_bounds = array<i64: 1>, scalar_prefetch = 0 : i64, scratch_operands = 0 : i64, tpu.core_type = #tpu.core_type<tc>, window_params = [{transform_indices = @transform_0, window_bounds = array<i64: 8, 256>}, {transform_indices = @transform_1, window_bounds = array<i64: 8, 256>}]} {
    %c0 = arith.constant 0 : index
    %c0_0 = arith.constant 0 : index
    %0 = vector.load %arg1[%c0, %c0_0] : memref<8x256xf32, #tpu.memory_space<vmem>>, vector<8x256xf32>
    %cst = arith.constant dense<0.000000e+00> : vector<8xf32>
    %1 = vector.multi_reduction <add>, %0, %cst [1] : vector<8x256xf32> to vector<8xf32>
    %2 = vector.shape_cast %1 : vector<8xf32> to vector<8x1xf32>
    %cst_1 = arith.constant 3.906250e-03 : f32
    %3 = vector.broadcast %cst_1 : f32 to vector<8x1xf32>
    %4 = arith.mulf %2, %3 : vector<8x1xf32>
    %5 = vector.broadcast %4 : vector<8x1xf32> to vector<8x256xf32>
    %6 = arith.addf %0, %5 : vector<8x256xf32>
    %c0_2 = arith.constant 0 : index
    %c0_3 = arith.constant 0 : index
    %7 = vector.load %arg2[%c0_2, %c0_3] : memref<8x256xf32, #tpu.memory_space<vmem>>, vector<8x256xf32>
    tpu.vector_store %arg2[%c0_2, %c0_3], %6 {strides = array<i32>} : memref<8x256xf32, #tpu.memory_space<vmem>>, vector<8x256xf32>,
    return
  }
  func.func @transform_0(%arg0: i32) -> (i32, i32) {
    %c0_i32 = arith.constant 0 : i32
    %c0_i32_0 = arith.constant 0 : i32
    return %arg0, %c0_i32 : i32, i32
  }
  func.func @transform_1(%arg0: i32) -> (i32, i32) {
    %c0_i32 = arith.constant 0 : i32
    %c0_i32_0 = arith.constant 0 : i32
    return %arg0, %c0_i32 : i32, i32
  }
}

</mosaic_0001>

<bundles_post_ra>
// kernel: tpu_custom_call.1
= control target key start
LH: loop header
LB: loop body
LE: loop exit
PB: predicated region body
PF: predicated region fallthrough
CT: control target
= control target key end

     0   :  { %6 = vsyncpa [#allocation3], 0  ;;  %s122_s0 = inlined_call_operand.hbm [shape: f32[8,256], index: 0, kind: input, shape index: {}]   ;;  %s123_s1 = inlined_call_operand.hbm [shape: f32[8,256], index: 1, kind: output, shape index: {}]  }
   0x1   :  { %7 = vsyncpa [#allocation4], 0  ;;  %s13_s8 = sshll.u32 %s122_s0, 4  ;;  %s104_s9 = smov [#allocation2]   ;;  %s14_s8 = int_to_ptr.hbm [resolvable:$true] %s13_s8 }
   0x2   :  { %s15_s10 = sshll.u32 %s104_s9, 4  ;;  %s16_s10 = int_to_ptr.vmem [resolvable:$true] %s15_s10 }
   0x3   :  { %18 = dma.hbm_to_vmem [thread:$0]  %s14_s8, 256, %s16_s10, [#allocation3]  }
   0x4   :  { %100 = dma.done.wait [#allocation3], 256  }
   0x5   :  { %101 = vsyncadd [#allocation3], 4294967040  ;;  %v23_v0 = vld [vmem:[#allocation2] sm:$0xff]  ;;  %v24_v1 = vld [vmem:[#allocation2 + $0x8] sm:$0xff]  ;;  %s105_s11 = smov [#allocation5]   ;;  %s40_s15 = sshll.u32 %s123_s1, 4  ;;  %s41_s15 = int_to_ptr.hbm [resolvable:$true] %s40_s15 }
   0x6   :  { %v25_v2 = vadd.f32 %v24_v1, %v23_v0  ;;  %s38_s12 = sshll.u32 %s105_s11, 4  ;;  %s39_s12 = int_to_ptr.vmem [resolvable:$true] %s38_s12 }
   0x8   :  { %26 = vadd.xlane.f32.xlu0 %v25_v2 }
  0x7b   :  { %v27_v3 = vpop.xlane.xlu0 %26 }
  0x7c   :  { %v28_v4 = vmul.f32 0.00390625, %v27_v3 }
  0x7e   :  { %v29_v5 = vadd.f32 %v28_v4, %v23_v0  ;;  %v30_v6 = vadd.f32 %v28_v4, %v24_v1 }
  0x80   :  { %31 = vst [vmem:[#allocation5] sm:$0xff] %v29_v5 }
  0x81   :  { %32 = vst [vmem:[#allocation5 + $0x8] sm:$0xff] %v30_v6 }
  0x82   :  { %43 = dma.vmem_to_hbm [thread:$0]  %s39_s12, 256, %s41_s15, [#allocation4]  }
  0x83   :  { %102 = dma.done.wait [#allocation4], 256  }
  0x84   :  { %103 = vsyncadd [#allocation4], 4294967040 }
  0x85   :  { %48 = vsyncpa [#allocation3], 1 }
  0x86   :  { %49 = vsyncpa [#allocation4], 1 }

</bundles_post_ra>
